<compile_context>
chip_gen: v7x
topology: tpu7x:2x2x1
jax: 0.10.0
libtpu: 0.0.40
codegen_flags: <defaults>
</compile_context>

<pallas_src>
import functools
import math

import jax
import jax.numpy as jnp
from jax.experimental import pallas as pl
from jax.experimental.pallas import tpu as pltpu

LOG_STD_MAX = 2.0
LOG_STD_MIN = -20.0
_HALF_LOG_2PI = 0.5 * math.log(2.0 * math.pi)
_LOG2 = math.log(2.0)


def _actor_kernel(x_ref, w1_ref, b1_ref, w2_ref, b2_ref, wh_ref, bh_ref,
                  eps_ref, action_ref, lprob_ref, *, action_dim):
    x = x_ref[...]

    # phi = Sequential(Linear + ReLU, Linear + ReLU)
    h = jnp.dot(x, w1_ref[...], preferred_element_type=jnp.float32) + b1_ref[...]
    h = jnp.maximum(h, 0.0)
    h = jnp.dot(h, w2_ref[...], preferred_element_type=jnp.float32) + b2_ref[...]
    h = jnp.maximum(h, 0.0)

    # fused mu / log_std heads: single [h2, 2*A] matmul, split along lanes
    y = jnp.dot(h, wh_ref[...], preferred_element_type=jnp.float32) + bh_ref[...]
    mu = y[:, :action_dim]
    log_std = jnp.clip(y[:, action_dim:], LOG_STD_MIN, LOG_STD_MAX)
    std = jnp.exp(log_std)

    # rsample: pre_tanh = mu + std * eps
    eps = eps_ref[...]
    pre = mu + std * eps

    # Normal(mu, std).log_prob(pre); note (pre - mu)/std == eps exactly
    logp = -0.5 * eps * eps - log_std - _HALF_LOG_2PI

    # tanh-squash correction: 2*(log 2 - a - softplus(-2a))
    t = -2.0 * pre
    softplus_t = jnp.maximum(t, 0.0) + jnp.log1p(jnp.exp(-jnp.abs(t)))  # stable softplus
    corr = 2.0 * (_LOG2 - pre - softplus_t)

    # single fused lane reduction
    lprob_ref[...] = jnp.sum(logp - corr, axis=-1, keepdims=True)
    action_ref[...] = jnp.tanh(pre)


def squashed_gaussian_actor(x, params, eps, *, tile_b=512):
    """x: [B, obs_dim], eps: [B, action_dim]. Returns (action [B, A], lprob [B])."""
    w1, b1, w2, b2, wh, bh = params
    B, obs_dim = x.shape
    A = eps.shape[1]
    h1 = w1.shape[1]
    h2 = w2.shape[1]

    # Pick a batch tile that is a multiple of 8 (sublane) and at most the
    # (8-rounded) batch; pad the batch so it divides evenly into tiles.
    tile_b = max(8, min((tile_b // 8) * 8, pl.cdiv(B, 8) * 8))
    Bp = pl.cdiv(B, tile_b) * tile_b
    if Bp != B:
        pad = Bp - B
        x = jnp.pad(x, ((0, pad), (0, 0)))
        eps = jnp.pad(eps, ((0, pad), (0, 0)))

    grid = (Bp // tile_b,)

    pinned = lambda shape: pl.BlockSpec(shape, lambda i: (0, 0))  # VMEM-resident weights
    kernel = functools.partial(_actor_kernel, action_dim=A)

    action, lprob = pl.pallas_call(
        kernel,
        out_shape=(
            jax.ShapeDtypeStruct((Bp, A), jnp.float32),
            jax.ShapeDtypeStruct((Bp, 1), jnp.float32),
        ),
        grid=grid,
        in_specs=[
            pl.BlockSpec((tile_b, obs_dim), lambda i: (i, 0)),   # x (streamed)
            pinned((obs_dim, h1)),                               # w1
            pinned((1, h1)),                                     # b1
            pinned((h1, h2)),                                    # w2
            pinned((1, h2)),                                     # b2
            pinned((h2, 2 * A)),                                 # fused head weight
            pinned((1, 2 * A)),                                  # fused head bias
            pl.BlockSpec((tile_b, A), lambda i: (i, 0)),         # eps (streamed)
        ],
        out_specs=(
            pl.BlockSpec((tile_b, A), lambda i: (i, 0)),         # action
            pl.BlockSpec((tile_b, 1), lambda i: (i, 0)),         # lprob
        ),
        compiler_params=pltpu.CompilerParams(
            dimension_semantics=("parallel",),       # megacore split on v7x
            vmem_limit_bytes=32 * 1024 * 1024,       # raise v5e's 16 MiB default; safe on v7x
        ),
    )(x, w1, b1, w2, b2, wh, bh, eps)

    return action[:B], lprob[:B, 0]


def _orthogonal(key, shape):
    """Deterministic orthogonal init (mirrors nn.init.orthogonal_ semantics)."""
    n = max(shape)
    a = jax.random.normal(key, (n, n), dtype=jnp.float32)
    q, r = jnp.linalg.qr(a)
    q = q * jnp.sign(jnp.diag(r))[None, :]
    return q[: shape[0], : shape[1]].astype(jnp.float32)


def make_params(key, obs_dim, hidden_sizes, action_dim):
    h1, h2 = hidden_sizes
    k1, k2, k3, k4 = jax.random.split(key, 4)
    # weights stored as [in, out]; biases as [1, out] (zero, per orthogonal_weight_init)
    w1 = _orthogonal(k1, (obs_dim, h1))
    b1 = jnp.zeros((1, h1), jnp.float32)
    w2 = _orthogonal(k2, (h1, h2))
    b2 = jnp.zeros((1, h2), jnp.float32)
    wmu = _orthogonal(k3, (h2, action_dim))
    wls = _orthogonal(k4, (h2, action_dim))
    # fuse mu / log_std heads: [h2, 2*A] weight, [1, 2*A] bias
    wh = jnp.concatenate([wmu, wls], axis=1)
    bh = jnp.zeros((1, 2 * action_dim), jnp.float32)
    # TODO(synk): for large hidden sizes on v6e/v7x, store w1/w2/wh in bf16
    # (keep f32 accumulation) to halve weight DMA / VMEM footprint.
    return (w1, b1, w2, b2, wh, bh)


if __name__ == "__main__":
    obs_dim = 16
    hidden_sizes = [32, 32]
    action_dim = 4
    batch = 8

    root = jax.random.PRNGKey(0)
    k_param, k_x, k_eps = jax.random.split(root, 3)

    params = make_params(k_param, obs_dim, hidden_sizes, action_dim)
    x = jax.random.normal(k_x, (batch, obs_dim), dtype=jnp.float32)
    # deterministic reparameterization noise for dist.rsample()
    eps = jax.random.normal(k_eps, (batch, action_dim), dtype=jnp.float32)

    action, lprob = squashed_gaussian_actor(x, params, eps)
    jax.block_until_ready((action, lprob))

    assert action.shape == (batch, action_dim)
    assert lprob.shape == (batch,)
    assert bool(jnp.all(jnp.isfinite(action))) and bool(jnp.all(jnp.isfinite(lprob)))
    assert bool(jnp.all(jnp.abs(action) <= 1.0))
    print("KERNEL_OK")
</pallas_src>

<mosaic_0001>
module attributes {stable_mosaic.version = 11 : i64} {
  func.func @_actor_kernel(%arg0: i32, %arg1: memref<8x16xf32, #tpu.memory_space<vmem>>, %arg2: memref<16x32xf32, #tpu.memory_space<vmem>>, %arg3: memref<1x32xf32, #tpu.memory_space<vmem>>, %arg4: memref<32x32xf32, #tpu.memory_space<vmem>>, %arg5: memref<1x32xf32, #tpu.memory_space<vmem>>, %arg6: memref<32x8xf32, #tpu.memory_space<vmem>>, %arg7: memref<1x8xf32, #tpu.memory_space<vmem>>, %arg8: memref<8x4xf32, #tpu.memory_space<vmem>>, %arg9: memref<8x4xf32, #tpu.memory_space<vmem>>, %arg10: memref<8x1xf32, #tpu.memory_space<vmem>>) attributes {dimension_semantics = [#tpu.dimension_semantics<parallel>], iteration_bounds = array<i64: 1>, scalar_prefetch = 0 : i64, scratch_operands = 0 : i64, tpu.core_type = #tpu.core_type<tc>, window_params = [{transform_indices = @transform_0, window_bounds = array<i64: 8, 16>}, {pipeline_mode = #tpu.pipeline_mode<synchronous>, transform_indices = @transform_1, window_bounds = array<i64: 16, 32>}, {pipeline_mode = #tpu.pipeline_mode<synchronous>, transform_indices = @transform_2, window_bounds = array<i64: 1, 32>}, {pipeline_mode = #tpu.pipeline_mode<synchronous>, transform_indices = @transform_3, window_bounds = array<i64: 32, 32>}, {pipeline_mode = #tpu.pipeline_mode<synchronous>, transform_indices = @transform_4, window_bounds = array<i64: 1, 32>}, {pipeline_mode = #tpu.pipeline_mode<synchronous>, transform_indices = @transform_5, window_bounds = array<i64: 32, 8>}, {pipeline_mode = #tpu.pipeline_mode<synchronous>, transform_indices = @transform_6, window_bounds = array<i64: 1, 8>}, {transform_indices = @transform_7, window_bounds = array<i64: 8, 4>}, {transform_indices = @transform_8, window_bounds = array<i64: 8, 4>}, {transform_indices = @transform_9, window_bounds = array<i64: 8, 1>}]} {
    %c0 = arith.constant 0 : index
    %c0_0 = arith.constant 0 : index
    %0 = vector.load %arg1[%c0, %c0_0] : memref<8x16xf32, #tpu.memory_space<vmem>>, vector<8x16xf32>
    %c0_1 = arith.constant 0 : index
    %c0_2 = arith.constant 0 : index
    %1 = vector.load %arg2[%c0_1, %c0_2] : memref<16x32xf32, #tpu.memory_space<vmem>>, vector<16x32xf32>
    %cst = arith.constant dense<0.000000e+00> : vector<8x32xf32>
    %2 = tpu.matmul %0, %1, %cst {dimension_numbers = #tpu.dot_dimension_numbers<[1], [0], [0], [1], [0, 0, 1, 1], [], []>} : vector<8x16xf32>, vector<16x32xf32>, vector<8x32xf32> -> vector<8x32xf32>
    %c0_3 = arith.constant 0 : index
    %c0_4 = arith.constant 0 : index
    %3 = vector.load %arg3[%c0_3, %c0_4] : memref<1x32xf32, #tpu.memory_space<vmem>>, vector<1x32xf32>
    %4 = vector.broadcast %3 : vector<1x32xf32> to vector<8x32xf32>
    %5 = arith.addf %2, %4 : vector<8x32xf32>
    %cst_5 = arith.constant 0.000000e+00 : f32
    %6 = vector.broadcast %cst_5 : f32 to vector<8x32xf32>
    %7 = arith.maximumf %5, %6 : vector<8x32xf32>
    %c0_6 = arith.constant 0 : index
    %c0_7 = arith.constant 0 : index
    %8 = vector.load %arg4[%c0_6, %c0_7] : memref<32x32xf32, #tpu.memory_space<vmem>>, vector<32x32xf32>
    %cst_8 = arith.constant dense<0.000000e+00> : vector<8x32xf32>
    %9 = tpu.matmul %7, %8, %cst_8 {dimension_numbers = #tpu.dot_dimension_numbers<[1], [0], [0], [1], [0, 0, 1, 1], [], []>} : vector<8x32xf32>, vector<32x32xf32>, vector<8x32xf32> -> vector<8x32xf32>
    %c0_9 = arith.constant 0 : index
    %c0_10 = arith.constant 0 : index
    %10 = vector.load %arg5[%c0_9, %c0_10] : memref<1x32xf32, #tpu.memory_space<vmem>>, vector<1x32xf32>
    %11 = vector.broadcast %10 : vector<1x32xf32> to vector<8x32xf32>
    %12 = arith.addf %9, %11 : vector<8x32xf32>
    %cst_11 = arith.constant 0.000000e+00 : f32
    %13 = vector.broadcast %cst_11 : f32 to vector<8x32xf32>
    %14 = arith.maximumf %12, %13 : vector<8x32xf32>
    %c0_12 = arith.constant 0 : index
    %c0_13 = arith.constant 0 : index
    %15 = vector.load %arg6[%c0_12, %c0_13] : memref<32x8xf32, #tpu.memory_space<vmem>>, vector<32x8xf32>
    %cst_14 = arith.constant dense<0.000000e+00> : vector<8x8xf32>
    %16 = tpu.matmul %14, %15, %cst_14 {dimension_numbers = #tpu.dot_dimension_numbers<[1], [0], [0], [1], [0, 0, 1, 1], [], []>} : vector<8x32xf32>, vector<32x8xf32>, vector<8x8xf32> -> vector<8x8xf32>
    %c0_15 = arith.constant 0 : index
    %c0_16 = arith.constant 0 : index
    %17 = vector.load %arg7[%c0_15, %c0_16] : memref<1x8xf32, #tpu.memory_space<vmem>>, vector<1x8xf32>
    %18 = vector.broadcast %17 : vector<1x8xf32> to vector<8x8xf32>
    %19 = arith.addf %16, %18 : vector<8x8xf32>
    %20 = vector.extract_strided_slice %19 {offsets = [0, 0], sizes = [8, 4], strides = [1, 1]} : vector<8x8xf32> to vector<8x4xf32>
    %21 = vector.extract_strided_slice %19 {offsets = [0, 4], sizes = [8, 4], strides = [1, 1]} : vector<8x8xf32> to vector<8x4xf32>
    %cst_17 = arith.constant -2.000000e+01 : f32
    %cst_18 = arith.constant 2.000000e+00 : f32
    %22 = vector.broadcast %cst_17 : f32 to vector<8x4xf32>
    %23 = arith.maximumf %22, %21 : vector<8x4xf32>
    %24 = vector.broadcast %cst_18 : f32 to vector<8x4xf32>
    %25 = arith.minimumf %24, %23 : vector<8x4xf32>
    %26 = math.exp %25 : vector<8x4xf32>
    %c0_19 = arith.constant 0 : index
    %c0_20 = arith.constant 0 : index
    %27 = vector.load %arg8[%c0_19, %c0_20] : memref<8x4xf32, #tpu.memory_space<vmem>>, vector<8x4xf32>
    %28 = arith.mulf %26, %27 : vector<8x4xf32>
    %29 = arith.addf %20, %28 : vector<8x4xf32>
    %cst_21 = arith.constant -5.000000e-01 : f32
    %30 = vector.broadcast %cst_21 : f32 to vector<8x4xf32>
    %31 = arith.mulf %30, %27 : vector<8x4xf32>
    %32 = arith.mulf %31, %27 : vector<8x4xf32>
    %33 = arith.subf %32, %25 : vector<8x4xf32>
    %cst_22 = arith.constant 0.918938517 : f32
    %34 = vector.broadcast %cst_22 : f32 to vector<8x4xf32>
    %35 = arith.subf %33, %34 : vector<8x4xf32>
    %cst_23 = arith.constant -2.000000e+00 : f32
    %36 = vector.broadcast %cst_23 : f32 to vector<8x4xf32>
    %37 = arith.mulf %36, %29 : vector<8x4xf32>
    %cst_24 = arith.constant 0.000000e+00 : f32
    %38 = vector.broadcast %cst_24 : f32 to vector<8x4xf32>
    %39 = arith.maximumf %37, %38 : vector<8x4xf32>
    %40 = math.absf %37 : vector<8x4xf32>
    %cst_25 = arith.constant 0.000000e+00 : f32
    %41 = vector.broadcast %cst_25 : f32 to vector<8x4xf32>
    %42 = arith.subf %41, %40 : vector<8x4xf32>
    %43 = math.exp %42 : vector<8x4xf32>
    %44 = math.log1p %43 : vector<8x4xf32>
    %45 = arith.addf %39, %44 : vector<8x4xf32>
    %cst_26 = arith.constant 0.693147182 : f32
    %46 = vector.broadcast %cst_26 : f32 to vector<8x4xf32>
    %47 = arith.subf %46, %29 : vector<8x4xf32>
    %48 = arith.subf %47, %45 : vector<8x4xf32>
    %cst_27 = arith.constant 2.000000e+00 : f32
    %49 = vector.broadcast %cst_27 : f32 to vector<8x4xf32>
    %50 = arith.mulf %49, %48 : vector<8x4xf32>
    %51 = arith.subf %35, %50 : vector<8x4xf32>
    %cst_28 = arith.constant dense<0.000000e+00> : vector<8xf32>
    %52 = vector.multi_reduction <add>, %51, %cst_28 [1] : vector<8x4xf32> to vector<8xf32>
    %53 = vector.shape_cast %52 : vector<8xf32> to vector<8x1xf32>
    %c0_29 = arith.constant 0 : index
    %c0_30 = arith.constant 0 : index
    %54 = vector.load %arg10[%c0_29, %c0_30] : memref<8x1xf32, #tpu.memory_space<vmem>>, vector<8x1xf32>
    tpu.vector_store %arg10[%c0_29, %c0_30], %53 {strides = array<i32>} : memref<8x1xf32, #tpu.memory_space<vmem>>, vector<8x1xf32>,
    %55 = math.tanh %29 : vector<8x4xf32>
    %c0_31 = arith.constant 0 : index
    %c0_32 = arith.constant 0 : index
    %56 = vector.load %arg9[%c0_31, %c0_32] : memref<8x4xf32, #tpu.memory_space<vmem>>, vector<8x4xf32>
    tpu.vector_store %arg9[%c0_31, %c0_32], %55 {strides = array<i32>} : memref<8x4xf32, #tpu.memory_space<vmem>>, vector<8x4xf32>,
    return
  }
  func.func @transform_0(%arg0: i32) -> (i32, i32) {
    %c0_i32 = arith.constant 0 : i32
    %c0_i32_0 = arith.constant 0 : i32
    return %arg0, %c0_i32 : i32, i32
  }
  func.func @transform_1(%arg0: i32) -> (i32, i32) {
    %c0_i32 = arith.constant 0 : i32
    %c0_i32_0 = arith.constant 0 : i32
    %c0_i32_1 = arith.constant 0 : i32
    return %c0_i32, %c0_i32_0 : i32, i32
  }
  func.func @transform_2(%arg0: i32) -> (i32, i32) {
    %c0_i32 = arith.constant 0 : i32
    %c0_i32_0 = arith.constant 0 : i32
    %c0_i32_1 = arith.constant 0 : i32
    return %c0_i32, %c0_i32_0 : i32, i32
  }
  func.func @transform_3(%arg0: i32) -> (i32, i32) {
    %c0_i32 = arith.constant 0 : i32
    %c0_i32_0 = arith.constant 0 : i32
    %c0_i32_1 = arith.constant 0 : i32
    return %c0_i32, %c0_i32_0 : i32, i32
  }
  func.func @transform_4(%arg0: i32) -> (i32, i32) {
    %c0_i32 = arith.constant 0 : i32
    %c0_i32_0 = arith.constant 0 : i32
    %c0_i32_1 = arith.constant 0 : i32
    return %c0_i32, %c0_i32_0 : i32, i32
  }
  func.func @transform_5(%arg0: i32) -> (i32, i32) {
    %c0_i32 = arith.constant 0 : i32
    %c0_i32_0 = arith.constant 0 : i32
    %c0_i32_1 = arith.constant 0 : i32
    return %c0_i32, %c0_i32_0 : i32, i32
  }
  func.func @transform_6(%arg0: i32) -> (i32, i32) {
    %c0_i32 = arith.constant 0 : i32
    %c0_i32_0 = arith.constant 0 : i32
    %c0_i32_1 = arith.constant 0 : i32
    return %c0_i32, %c0_i32_0 : i32, i32
  }
  func.func @transform_7(%arg0: i32) -> (i32, i32) {
    %c0_i32 = arith.constant 0 : i32
    %c0_i32_0 = arith.constant 0 : i32
    return %arg0, %c0_i32 : i32, i32
  }
  func.func @transform_8(%arg0: i32) -> (i32, i32) {
    %c0_i32 = arith.constant 0 : i32
    %c0_i32_0 = arith.constant 0 : i32
    return %arg0, %c0_i32 : i32, i32
  }
  func.func @transform_9(%arg0: i32) -> (i32, i32) {
    %c0_i32 = arith.constant 0 : i32
    %c0_i32_0 = arith.constant 0 : i32
    return %arg0, %c0_i32 : i32, i32
  }
}

</mosaic_0001>

<bundles_post_ra>
// kernel: tpu_custom_call.1
= control target key start
LH: loop header
LB: loop body
LE: loop exit
PB: predicated region body
PF: predicated region fallthrough
CT: control target
= control target key end

     0   :  { %v422_v0 = vmov 0.0|0.0   ;;  %vm423_vm0 = vmmov 0   ;;  %v424_v3 = vmov 0.0   ;;  %vm41_vm1 = vcmask 130048   ;;  %s535_s1 = inlined_call_operand.vmem [shape: f32[16,32], index: 1, kind: input, shape index: {}]   ;;  %s536_s3 = inlined_call_operand.vmem [shape: f32[32,32], index: 3, kind: input, shape index: {}]   ;;  %s537_s0 = inlined_call_operand.vmem [shape: f32[8,16], index: 0, kind: input, shape index: {}]   ;;  %s538_s5 = inlined_call_operand.vmem [shape: f32[32,8], index: 5, kind: input, shape index: {}]   ;;  %s539_s2 = inlined_call_operand.vmem [shape: f32[1,32], index: 2, kind: input, shape index: {}]   ;;  %s540_s7 = inlined_call_operand.vmem [shape: f32[8,4], index: 7, kind: input, shape index: {}]   ;;  %s541_s4 = inlined_call_operand.vmem [shape: f32[1,32], index: 4, kind: input, shape index: {}]   ;;  %s542_s6 = inlined_call_operand.vmem [shape: f32[1,8], index: 6, kind: input, shape index: {}]   ;;  %s543_s8 = inlined_call_operand.vmem [shape: f32[8,4], index: 8, kind: output, shape index: {0}]   ;;  %s544_s9 = inlined_call_operand.vmem [shape: f32[8,1], index: 9, kind: output, shape index: {1}]  }
   0x1   :  { %394 = vmatprep.subr.bf16.mxu0 %v422_v0  ;;  %v32_v1 = vld [vmem:[%s535_s1] sm:$0xff]  ;;  %v33_v2 = vld [vmem:[%s535_s1 + $0x8] sm:$0xff]  ;;  %369 = vmatprep.mubr.msk.f32.mxu0 %vm423_vm0, %v424_v3  ;;  %v118_v9 = vld [vmem:[%s536_s3 + $0x10] sm:$0xff]  ;;  %vm127_vm2 = vcmask 261120   ;;  %vm329_vm3 = vcmask 31744   ;;  %vm333_vm5 = vcmask 7168  }
   0x2   :  { %v395_v4 = vpack.c.bf16 %v33_v2, %v32_v1  ;;  %397 = vmatprep.subr.bf16.mxu1 %v422_v0  ;;  %v116_v5 = vld [vmem:[%s536_s3] sm:$0xff]  ;;  %v117_v6 = vld [vmem:[%s536_s3 + $0x8] sm:$0xff]  ;;  %380 = vmatprep.mubr.msk.f32.mxu1 %vm423_vm0, %v424_v3  ;;  %v119_v10 = vld [vmem:[%s536_s3 + $0x18] sm:$0xff] }
   0x3   :  { %v398_v7 = vpack.c.bf16 %v117_v6, %v116_v5  ;;  %v31_v8 = vld [vmem:[%s537_s0] sm:$0xff]  ;;  %v401_v11 = vpack.c.bf16 %v119_v10, %v118_v9  ;;  %v203_v13 = vld [vmem:[%s538_s5 + $0x8] sm:$0xff]  ;;  %v204_v20 = vld [vmem:[%s538_s5 + $0x10] sm:$0xff] }
   0x4   :  { %396 = vmatpush3.bf16.msra.mxu0 %v395_v4  ;;  %v202_v12 = vld [vmem:[%s538_s5] sm:$0xff]  ;;  %v205_v21 = vld [vmem:[%s538_s5 + $0x18] sm:$0xff] }
   0x5   :  { %399 = vmatpush3.bf16.msra.mxu1 %v398_v7  ;;  %403 = vmatprep.subr.bf16.mxu0 %v422_v0  ;;  %v404_v14 = vpack.c.bf16 %v203_v13, %v202_v12  ;;  %v345_v15 = vld [vmem:[%s539_s2] ss:$0 sm:$0xff]  ;;  %v407_v22 = vpack.c.bf16 %v205_v21, %v204_v20  ;;  %s425_s2 = smov 4  }
   0x6   :  { %400 = vmatprep.subr.bf16.mxu1 %v422_v0  ;;  %v290_v23 = vld [vmem:[%s540_s7] sm:$0xff]  ;;  %s426_s7 = smov 124  }
   0x7   :  { %370 = vmatmul.mubr.msk.f32.vlgmr.msra.gmra.mrb[0].mxu0 %vm41_vm1, %v31_v8  ;;  %292 = vrot.lane.b32.xlu0 %v290_v23, %s425_s2  ;;  %v347_v24 = vld [vmem:[%s541_s4] ss:$0 sm:$0xff]  ;;  %v301_v49 = vmul.f32 -0.5, %v290_v23 }
   0x8   :  { %391 = vmatprep.mubr.msk.f32.mxu0 %vm423_vm0, %v424_v3  ;;  %405 = vmatpush3.bf16.msra.mxu0 %v404_v14  ;;  %v349_v29 = vld [vmem:[%s542_s6] ss:$0 sm:$0xff] }
   0x9   :  { %402 = vmatpush3.bf16.msra.mxu1 %v401_v11  ;;  %406 = vmatprep.subr.bf16.mxu0 %v422_v0  ;;  %v302_v53 = vmul.f32 %v301_v49, %v290_v23 }
   0xc   :  { %408 = vmatpush3.bf16.msra.mxu0 %v407_v22 }
  0x79   :  { %v293_v36 = vpop.permute.xlu0 %292 }
  0xda   :  { %v111_v16 = vpop.f32.mrb[0].mxu0 }
  0xdb   :  { %v112_v17 = vadd.f32 %v345_v15, %v111_v16  ;;  %v371_v18 = vpop.f32.mrb[1].mxu0 }
  0xdd   :  { %v115_v19 = vmax.f32 %v112_v17, 0.0 }
  0xdf   :  { %381 = vmatmul.mubr.msk.f32.vlgmr.msra.gmra.mrb[0].mxu1 %vm127_vm2, %v115_v19 }
 0x1b2   :  { %v197_v25 = vpop.f32.mrb[0].mxu1 }
 0x1b3   :  { %v198_v26 = vadd.f32 %v347_v24, %v197_v25  ;;  %v382_v27 = vpop.f32.mrb[1].mxu1 }
 0x1b5   :  { %v201_v28 = vmax.f32 %v198_v26, 0.0 }
 0x1b7   :  { %392 = vmatmul.mubr.msk.f32.vlgmr.msra.gmra.mrb[2].mxu0 %vm127_vm2, %v201_v28 }
 0x28a   :  { %v282_v30 = vpop.f32.mrb[2].mxu0 }
 0x28b   :  { %v283_v31 = vadd.f32 %v349_v29, %v282_v30  ;;  %v393_v32 = vpop.f32.mrb[3].mxu0 }
 0x28d   :  { %v286_v33 = vmax.f32 %v283_v31, -20.0 }
 0x28f   :  { %v287_v34 = vmin.f32 %v286_v33, 2.0 }
 0x291   :  { %304 = vrot.lane.b32.xlu1 %v287_v34, %s426_s7  ;;  %v288_v35 = vmul.f32 1.442695, %v287_v34 }
 0x293   :  { %414 = vpow2.f32 %v288_v35 }
 0x29d   :  { %v415_v37 = vpop.eup %414 }
 0x29e   :  { %v295_v38 = vmul.f32 %v415_v37, %v293_v36 }
 0x2a0   :  { %297 = vrot.lane.b32.xlu0 %v295_v38, %s426_s7 }
 0x303   :  { %v305_v54 = vpop.permute.xlu1 %304 }
 0x304   :  { %v307_v59 = vsub.f32 %v302_v53, %v305_v54 }
 0x306   :  { %v351_v63 = vadd.f32 -0.9189385, %v307_v59 }
 0x312   :  { %v298_v39 = vpop.permute.xlu0 %297 }
 0x313   :  { %v300_v40 = vadd.f32 %v298_v39, %v283_v31 }
 0x315   :  { %v309_v41 = vmul.f32 -2.0, %v300_v40  ;;  %416 = vtanh.f32 %v300_v40  ;;  %v325_v60 = vsub.f32 0.6931472, %v300_v40 }
 0x317   :  { %v311_v42 = vand.u32 2147483647, %v309_v41  ;;  %v310_v57 = vmax.f32 %v309_v41, 0.0 }
 0x319   :  { %v312_v43 = vsub.f32 0.0, %v311_v42 }
 0x31b   :  { %v313_v44 = vmul.f32 1.442695, %v312_v43 }
 0x31d   :  { %418 = vpow2.f32 %v313_v44 }
 0x31f   :  { %v417_v45 = vpop.eup %416 }
 0x320   :  { %336 = vst.msk [vmem:[%s543_s8] sm:$0xff] %vm329_vm3, %v417_v45 }
 0x327   :  { %v419_v46 = vpop.eup %418 }
 0x328   :  { %v315_v47 = vadd.f32 1.0, %v419_v46  ;;  %v318_v48 = vmul.f32 -0.5, %v419_v46  ;;  %v321_v51 = vand.u32 2147483647, %v419_v46 }
 0x32a   :  { %420 = vlog2.f32 %v315_v47  ;;  %v319_v50 = vadd.f32 1.0, %v318_v48  ;;  %vm322_vm4 = vcmp.lt.f32.partialorder %v321_v51, 0.0004427343 }
 0x32c   :  { %v320_v56 = vmul.f32 %v419_v46, %v319_v50 }
 0x334   :  { %v421_v52 = vpop.eup %420 }
 0x335   :  { %v317_v55 = vmul.f32 0.6931472, %v421_v52 }
 0x337   :  { %v323_v58 = vsel %vm322_vm4, %v320_v56, %v317_v55 }
 0x338   :  { %v324_v61 = vadd.f32 %v323_v58, %v310_v57 }
 0x33a   :  { %v326_v62 = vsub.f32 %v325_v60, %v324_v61 }
 0x33c   :  { %v327_v0 = vmul.f32 2.0, %v326_v62 }
 0x33e   :  { %v328_v1 = vsub.f32 %v351_v63, %v327_v0 }
 0x340   :  { %v330_v2 = vsel %vm329_vm3, %v328_v1, 0.0 }
 0x341   :  { %331 = vadd.xlane.f32.xlu1 %v330_v2 }
 0x3ce   :  { %v332_v3 = vpop.xlane.xlu1 %331 }
 0x3cf   :  { %334 = vst.msk [vmem:[%s544_s9] sm:$0xff] %vm333_vm5, %v332_v3 }

</bundles_post_ra>
